<compile_context>
chip_gen: v5e
topology: v5e:2x2
jax: 0.10.0
libtpu: 0.0.40
codegen_flags: <defaults>
</compile_context>

<pallas_src>
import functools

import jax
import jax.numpy as jnp
from jax.experimental import pallas as pl
from jax.experimental.pallas import tpu as pltpu


def _cls_kernel(x_ref, w_ref, b_ref, o_ref):
    # x_ref: (TB, K)    flattened NCHW activations (K = C*H*W)
    # w_ref: (K, Np)    pool-fused, 1/HW-scaled, lane-padded weight (resident)
    # b_ref: (1, Np)    lane-padded bias (resident)
    # o_ref: (TB, Np)   lane-dense output tile
    out = jnp.dot(x_ref[...], w_ref[...], preferred_element_type=jnp.float32)
    o_ref[...] = (out + b_ref[...]).astype(o_ref.dtype)


def prepare_classifier_params(weight, bias, hw):
    """One-time (non-per-call) parameter prep.

    weight: (N, C) PyTorch Linear layout; bias: (N,); hw: H*W of the pooled
    window.  Returns (w_fused (C*HW, Np), b_fused (1, Np)) with the 1/HW
    average-pool scale folded in and the output lanes padded to 128.
    """
    N, C = weight.shape
    n_pad = max(128, ((N + 127) // 128) * 128)
    # w_fused[c*HW + p, n] = weight[n, c] / HW  -> matmul over K == fused pool.
    w_fused = jnp.repeat(weight.T.astype(jnp.float32) / float(hw), hw, axis=0)
    w_fused = jnp.pad(w_fused, ((0, 0), (0, n_pad - N)))
    b_fused = jnp.pad(bias.astype(jnp.float32), (0, n_pad - N)).reshape(1, n_pad)
    return w_fused, b_fused


@functools.partial(jax.jit, static_argnames=("num_classes",))
def classification_model_forward(x_nchw, w_fused, b_fused, *, num_classes):
    """x_nchw: (B, C, H, W); w_fused/b_fused from prepare_classifier_params."""
    B, C, H, W = x_nchw.shape
    K = C * H * W
    n_pad = w_fused.shape[1]

    # Free reshape (row-major contiguous): lane-dense (B, K) operand.
    x_flat = x_nchw.reshape(B, K).astype(jnp.float32)

    # Batch tile: whole batch if small, else 512-row tiles (double-buffered
    # x tile for K=1568 f32 is ~6.4 MiB -> safe under v7x's 64 MiB VMEM).
    TB = B if B <= 512 else 512
    grid = (pl.cdiv(B, TB),)

    out = pl.pallas_call(
        _cls_kernel,
        out_shape=jax.ShapeDtypeStruct((B, n_pad), jnp.float32),
        grid=grid,
        in_specs=[
            pl.BlockSpec((TB, K), lambda i: (i, 0)),      # batch-tiled x
            pl.BlockSpec((K, n_pad), lambda i: (0, 0)),   # resident weight
            pl.BlockSpec((1, n_pad), lambda i: (0, 0)),   # resident bias
        ],
        out_specs=pl.BlockSpec((TB, n_pad), lambda i: (i, 0)),
        compiler_params=pltpu.CompilerParams(
            dimension_semantics=("parallel",),
        ),
    )(x_flat, w_fused, b_fused)

    out = out[:, :num_classes]
    # Final .squeeze() in the PyTorch model (no size-1 dims at these shapes).
    return jnp.squeeze(out)


if __name__ == "__main__":
    # Small shapes consistent with the module: in_channels=32, num_classes=16,
    # spatial 7x7 (required by AvgPool2d((7,7))), batch=4.
    B, C, N, H, W = 4, 32, 16, 7, 7

    key = jax.random.PRNGKey(0)
    kx, kw, kb = jax.random.split(key, 3)

    x = jax.random.normal(kx, (B, C, H, W), dtype=jnp.float32)

    # Deterministic PyTorch-style Linear init: U(-1/sqrt(C), 1/sqrt(C)).
    bound = 1.0 / jnp.sqrt(jnp.float32(C))
    weight = jax.random.uniform(kw, (N, C), minval=-bound, maxval=bound,
                                dtype=jnp.float32)
    bias = jax.random.uniform(kb, (N,), minval=-bound, maxval=bound,
                              dtype=jnp.float32)

    # One-time parameter prep (pool fusion, 1/49 scale, transpose, lane pad).
    w_fused, b_fused = prepare_classifier_params(weight, bias, H * W)
    w_fused = jax.block_until_ready(w_fused)
    b_fused = jax.block_until_ready(b_fused)

    out = classification_model_forward(x, w_fused, b_fused, num_classes=N)
    out = jax.block_until_ready(out)

    # Pure-JAX reference check of the same forward pass.
    ref = jnp.mean(x, axis=(2, 3)) @ weight.T + bias
    assert out.shape == (B, N), out.shape
    assert jnp.allclose(out, ref, atol=1e-4, rtol=1e-4), "mismatch vs reference"

    print("KERNEL_OK")
</pallas_src>

<mosaic_0001>
module attributes {stable_mosaic.version = 11 : i64} {
  func.func @_cls_kernel(%arg0: i32, %arg1: memref<4x1568xf32, #tpu.memory_space<vmem>>, %arg2: memref<1568x128xf32, #tpu.memory_space<vmem>>, %arg3: memref<1x128xf32, #tpu.memory_space<vmem>>, %arg4: memref<4x128xf32, #tpu.memory_space<vmem>>) attributes {dimension_semantics = [#tpu.dimension_semantics<parallel>], iteration_bounds = array<i64: 1>, scalar_prefetch = 0 : i64, scratch_operands = 0 : i64, tpu.core_type = #tpu.core_type<tc>, window_params = [{transform_indices = @transform_0, window_bounds = array<i64: 4, 1568>}, {pipeline_mode = #tpu.pipeline_mode<synchronous>, transform_indices = @transform_1, window_bounds = array<i64: 1568, 128>}, {pipeline_mode = #tpu.pipeline_mode<synchronous>, transform_indices = @transform_2, window_bounds = array<i64: 1, 128>}, {transform_indices = @transform_3, window_bounds = array<i64: 4, 128>}]} {
    %c0 = arith.constant 0 : index
    %c0_0 = arith.constant 0 : index
    %0 = vector.load %arg1[%c0, %c0_0] : memref<4x1568xf32, #tpu.memory_space<vmem>>, vector<4x1568xf32>
    %c0_1 = arith.constant 0 : index
    %c0_2 = arith.constant 0 : index
    %1 = vector.load %arg2[%c0_1, %c0_2] : memref<1568x128xf32, #tpu.memory_space<vmem>>, vector<1568x128xf32>
    %cst = arith.constant dense<0.000000e+00> : vector<4x128xf32>
    %2 = tpu.matmul %0, %1, %cst {dimension_numbers = #tpu.dot_dimension_numbers<[1], [0], [0], [1], [0, 0, 1, 1], [], []>} : vector<4x1568xf32>, vector<1568x128xf32>, vector<4x128xf32> -> vector<4x128xf32>
    %c0_3 = arith.constant 0 : index
    %c0_4 = arith.constant 0 : index
    %3 = vector.load %arg3[%c0_3, %c0_4] : memref<1x128xf32, #tpu.memory_space<vmem>>, vector<1x128xf32>
    %4 = vector.broadcast %3 : vector<1x128xf32> to vector<4x128xf32>
    %5 = arith.addf %2, %4 : vector<4x128xf32>
    %c0_5 = arith.constant 0 : index
    %c0_6 = arith.constant 0 : index
    %6 = vector.load %arg4[%c0_5, %c0_6] : memref<4x128xf32, #tpu.memory_space<vmem>>, vector<4x128xf32>
    tpu.vector_store %arg4[%c0_5, %c0_6], %5 {strides = array<i32>} : memref<4x128xf32, #tpu.memory_space<vmem>>, vector<4x128xf32>,
    return
  }
  func.func @transform_0(%arg0: i32) -> (i32, i32) {
    %c0_i32 = arith.constant 0 : i32
    %c0_i32_0 = arith.constant 0 : i32
    return %arg0, %c0_i32 : i32, i32
  }
  func.func @transform_1(%arg0: i32) -> (i32, i32) {
    %c0_i32 = arith.constant 0 : i32
    %c0_i32_0 = arith.constant 0 : i32
    %c0_i32_1 = arith.constant 0 : i32
    return %c0_i32, %c0_i32_0 : i32, i32
  }
  func.func @transform_2(%arg0: i32) -> (i32, i32) {
    %c0_i32 = arith.constant 0 : i32
    %c0_i32_0 = arith.constant 0 : i32
    %c0_i32_1 = arith.constant 0 : i32
    return %c0_i32, %c0_i32_0 : i32, i32
  }
  func.func @transform_3(%arg0: i32) -> (i32, i32) {
    %c0_i32 = arith.constant 0 : i32
    %c0_i32_0 = arith.constant 0 : i32
    return %arg0, %c0_i32 : i32, i32
  }
}

</mosaic_0001>

<bundles_post_ra>
// kernel: classification_model_forward.1
= control target key start
LH: loop header
LB: loop body
LE: loop exit
PB: predicated region body
PF: predicated region fallthrough
CT: control target
= control target key end

     0   :  { %s1215_s0 = inlined_call_operand.vmem [shape: f32[4,1568], index: 0, kind: input, shape index: {}]   ;;  %s1216_s1 = inlined_call_operand.vmem [shape: f32[1568,128], index: 1, kind: input, shape index: {}]   ;;  %s1217_s2 = inlined_call_operand.vmem [shape: f32[1,128], index: 2, kind: input, shape index: {}]   ;;  %s1218_s3 = inlined_call_operand.hbm [shape: f32[4,128], index: 3, kind: output, shape index: {}]  }
   0x1   :  { %v37_v0 = vld [vmem:[%s1216_s1 + $0x78] sm:$0xff]  ;;  %v36_v2 = vld [vmem:[%s1216_s1 + $0x70] sm:$0xff]  ;;  %v35_v6 = vld [vmem:[%s1216_s1 + $0x68] sm:$0xff] }
   0x2   :  { %v69_v1 = vld [vmem:[%s1216_s1 + $0x178] sm:$0xff]  ;;  %267 = vmatpush.msra.mxu0 %v37_v0  ;;  %v68_v4 = vld [vmem:[%s1216_s1 + $0x170] sm:$0xff]  ;;  %v67_v8 = vld [vmem:[%s1216_s1 + $0x168] sm:$0xff] }
   0x3   :  { %307 = vmatpush.msra.mxu2 %v69_v1  ;;  %v53_v3 = vld [vmem:[%s1216_s1 + $0xf8] sm:$0xff]  ;;  %v52_v7 = vld [vmem:[%s1216_s1 + $0xf0] sm:$0xff]  ;;  %v51_v10 = vld [vmem:[%s1216_s1 + $0xe8] sm:$0xff] }
   0x4   :  { %v85_v5 = vld [vmem:[%s1216_s1 + $0x1f8] sm:$0xff]  ;;  %287 = vmatpush.msra.mxu1 %v53_v3  ;;  %268 = vmatpush.msra.mxu0 %v36_v2  ;;  %v84_v9 = vld [vmem:[%s1216_s1 + $0x1f0] sm:$0xff]  ;;  %v34_v11 = vld [vmem:[%s1216_s1 + $0x60] sm:$0xff] }
   0x5   :  { %327 = vmatpush.msra.mxu3 %v85_v5  ;;  %308 = vmatpush.msra.mxu2 %v68_v4  ;;  %v66_v12 = vld [vmem:[%s1216_s1 + $0x160] sm:$0xff]  ;;  %v83_v13 = vld [vmem:[%s1216_s1 + $0x1e8] sm:$0xff]  ;;  %v33_v16 = vld [vmem:[%s1216_s1 + $0x58] sm:$0xff] }
   0x6   :  { %288 = vmatpush.msra.mxu1 %v52_v7  ;;  %269 = vmatpush.msra.mxu0 %v35_v6  ;;  %v50_v14 = vld [vmem:[%s1216_s1 + $0xe0] sm:$0xff]  ;;  %v65_v17 = vld [vmem:[%s1216_s1 + $0x158] sm:$0xff]  ;;  %v32_v20 = vld [vmem:[%s1216_s1 + $0x50] sm:$0xff] }
   0x7   :  { %328 = vmatpush.msra.mxu3 %v84_v9  ;;  %309 = vmatpush.msra.mxu2 %v67_v8  ;;  %v82_v15 = vld [vmem:[%s1216_s1 + $0x1e0] sm:$0xff]  ;;  %v49_v18 = vld [vmem:[%s1216_s1 + $0xd8] sm:$0xff]  ;;  %v64_v21 = vld [vmem:[%s1216_s1 + $0x150] sm:$0xff] }
   0x8   :  { %289 = vmatpush.msra.mxu1 %v51_v10  ;;  %270 = vmatpush.msra.mxu0 %v34_v11  ;;  %v81_v19 = vld [vmem:[%s1216_s1 + $0x1d8] sm:$0xff]  ;;  %v48_v22 = vld [vmem:[%s1216_s1 + $0xd0] sm:$0xff]  ;;  %v31_v24 = vld [vmem:[%s1216_s1 + $0x48] sm:$0xff] }
   0x9   :  { %329 = vmatpush.msra.mxu3 %v83_v13  ;;  %310 = vmatpush.msra.mxu2 %v66_v12  ;;  %v80_v23 = vld [vmem:[%s1216_s1 + $0x1d0] sm:$0xff]  ;;  %v63_v25 = vld [vmem:[%s1216_s1 + $0x148] sm:$0xff]  ;;  %v30_v28 = vld [vmem:[%s1216_s1 + $0x40] sm:$0xff] }
   0xa   :  { %290 = vmatpush.msra.mxu1 %v50_v14  ;;  %271 = vmatpush.msra.mxu0 %v33_v16  ;;  %v47_v26 = vld [vmem:[%s1216_s1 + $0xc8] sm:$0xff]  ;;  %v62_v29 = vld [vmem:[%s1216_s1 + $0x140] sm:$0xff]  ;;  %v29_v32 = vld [vmem:[%s1216_s1 + $0x38] sm:$0xff] }
   0xb   :  { %330 = vmatpush.msra.mxu3 %v82_v15  ;;  %311 = vmatpush.msra.mxu2 %v65_v17  ;;  %v79_v27 = vld [vmem:[%s1216_s1 + $0x1c8] sm:$0xff]  ;;  %v46_v30 = vld [vmem:[%s1216_s1 + $0xc0] sm:$0xff]  ;;  %v61_v33 = vld [vmem:[%s1216_s1 + $0x138] sm:$0xff] }
   0xc   :  { %291 = vmatpush.msra.mxu1 %v49_v18  ;;  %272 = vmatpush.msra.mxu0 %v32_v20  ;;  %v78_v31 = vld [vmem:[%s1216_s1 + $0x1c0] sm:$0xff]  ;;  %v45_v34 = vld [vmem:[%s1216_s1 + $0xb8] sm:$0xff]  ;;  %v28_v36 = vld [vmem:[%s1216_s1 + $0x30] sm:$0xff] }
   0xd   :  { %331 = vmatpush.msra.mxu3 %v81_v19  ;;  %312 = vmatpush.msra.mxu2 %v64_v21  ;;  %v77_v35 = vld [vmem:[%s1216_s1 + $0x1b8] sm:$0xff]  ;;  %v60_v37 = vld [vmem:[%s1216_s1 + $0x130] sm:$0xff]  ;;  %v27_v40 = vld [vmem:[%s1216_s1 + $0x28] sm:$0xff] }
   0xe   :  { %292 = vmatpush.msra.mxu1 %v48_v22  ;;  %273 = vmatpush.msra.mxu0 %v31_v24  ;;  %v44_v38 = vld [vmem:[%s1216_s1 + $0xb0] sm:$0xff]  ;;  %v59_v41 = vld [vmem:[%s1216_s1 + $0x128] sm:$0xff]  ;;  %v26_v44 = vld [vmem:[%s1216_s1 + $0x20] sm:$0xff] }
   0xf   :  { %332 = vmatpush.msra.mxu3 %v80_v23  ;;  %313 = vmatpush.msra.mxu2 %v63_v25  ;;  %v76_v39 = vld [vmem:[%s1216_s1 + $0x1b0] sm:$0xff]  ;;  %v43_v42 = vld [vmem:[%s1216_s1 + $0xa8] sm:$0xff]  ;;  %v58_v45 = vld [vmem:[%s1216_s1 + $0x120] sm:$0xff] }
  0x10   :  { %293 = vmatpush.msra.mxu1 %v47_v26  ;;  %274 = vmatpush.msra.mxu0 %v30_v28  ;;  %v75_v43 = vld [vmem:[%s1216_s1 + $0x1a8] sm:$0xff]  ;;  %v42_v46 = vld [vmem:[%s1216_s1 + $0xa0] sm:$0xff]  ;;  %v25_v48 = vld [vmem:[%s1216_s1 + $0x18] sm:$0xff] }
  0x11   :  { %333 = vmatpush.msra.mxu3 %v79_v27  ;;  %314 = vmatpush.msra.mxu2 %v62_v29  ;;  %v74_v47 = vld [vmem:[%s1216_s1 + $0x1a0] sm:$0xff]  ;;  %v57_v49 = vld [vmem:[%s1216_s1 + $0x118] sm:$0xff]  ;;  %v24_v52 = vld [vmem:[%s1216_s1 + $0x10] sm:$0xff] }
  0x12   :  { %294 = vmatpush.msra.mxu1 %v46_v30  ;;  %275 = vmatpush.msra.mxu0 %v29_v32  ;;  %v41_v50 = vld [vmem:[%s1216_s1 + $0x98] sm:$0xff]  ;;  %v56_v53 = vld [vmem:[%s1216_s1 + $0x110] sm:$0xff]  ;;  %v23_v56 = vld [vmem:[%s1216_s1 + $0x8] sm:$0xff] }
  0x13   :  { %334 = vmatpush.msra.mxu3 %v78_v31  ;;  %315 = vmatpush.msra.mxu2 %v61_v33  ;;  %v73_v51 = vld [vmem:[%s1216_s1 + $0x198] sm:$0xff]  ;;  %v40_v54 = vld [vmem:[%s1216_s1 + $0x90] sm:$0xff]  ;;  %v55_v57 = vld [vmem:[%s1216_s1 + $0x108] sm:$0xff] }
  0x14   :  { %295 = vmatpush.msra.mxu1 %v45_v34  ;;  %276 = vmatpush.msra.mxu0 %v28_v36  ;;  %v72_v55 = vld [vmem:[%s1216_s1 + $0x190] sm:$0xff]  ;;  %v39_v58 = vld [vmem:[%s1216_s1 + $0x88] sm:$0xff]  ;;  %v22_v60 = vld [vmem:[%s1216_s1] sm:$0xff] }
  0x15   :  { %335 = vmatpush.msra.mxu3 %v77_v35  ;;  %316 = vmatpush.msra.mxu2 %v60_v37  ;;  %v71_v59 = vld [vmem:[%s1216_s1 + $0x188] sm:$0xff]  ;;  %v54_v61 = vld [vmem:[%s1216_s1 + $0x100] sm:$0xff]  ;;  %v101_v62 = vld [vmem:[%s1216_s1 + $0x278] sm:$0xff] }
  0x16   :  { %296 = vmatpush.msra.mxu1 %v44_v38  ;;  %277 = vmatpush.msra.mxu0 %v27_v40  ;;  %v133_v63 = vld [vmem:[%s1216_s1 + $0x378] sm:$0xff]  ;;  %v38_v0 = vld [vmem:[%s1216_s1 + $0x80] sm:$0xff]  ;;  %v100_v2 = vld [vmem:[%s1216_s1 + $0x270] sm:$0xff] }
  0x17   :  { %336 = vmatpush.msra.mxu3 %v76_v39  ;;  %317 = vmatpush.msra.mxu2 %v59_v41  ;;  %v70_v1 = vld [vmem:[%s1216_s1 + $0x180] sm:$0xff]  ;;  %v117_v3 = vld [vmem:[%s1216_s1 + $0x2f8] sm:$0xff]  ;;  %v132_v4 = vld [vmem:[%s1216_s1 + $0x370] sm:$0xff] }
  0x18   :  { %297 = vmatpush.msra.mxu1 %v43_v42  ;;  %278 = vmatpush.msra.mxu0 %v26_v44  ;;  %v149_v5 = vld [vmem:[%s1216_s1 + $0x3f8] sm:$0xff]  ;;  %v99_v6 = vld [vmem:[%s1216_s1 + $0x268] sm:$0xff]  ;;  %v116_v7 = vld [vmem:[%s1216_s1 + $0x2f0] sm:$0xff] }
  0x19   :  { %337 = vmatpush.msra.mxu3 %v75_v43  ;;  %318 = vmatpush.msra.mxu2 %v58_v45  ;;  %v131_v8 = vld [vmem:[%s1216_s1 + $0x368] sm:$0xff]  ;;  %v148_v9 = vld [vmem:[%s1216_s1 + $0x3f0] sm:$0xff]  ;;  %v98_v10 = vld [vmem:[%s1216_s1 + $0x260] sm:$0xff] }
  0x1a   :  { %298 = vmatpush.msra.mxu1 %v42_v46  ;;  %279 = vmatpush.msra.mxu0 %v25_v48  ;;  %v115_v11 = vld [vmem:[%s1216_s1 + $0x2e8] sm:$0xff]  ;;  %v130_v12 = vld [vmem:[%s1216_s1 + $0x360] sm:$0xff]  ;;  %v97_v14 = vld [vmem:[%s1216_s1 + $0x258] sm:$0xff] }
  0x1b   :  { %338 = vmatpush.msra.mxu3 %v74_v47  ;;  %319 = vmatpush.msra.mxu2 %v57_v49  ;;  %v147_v13 = vld [vmem:[%s1216_s1 + $0x3e8] sm:$0xff]  ;;  %v114_v15 = vld [vmem:[%s1216_s1 + $0x2e0] sm:$0xff]  ;;  %v129_v16 = vld [vmem:[%s1216_s1 + $0x358] sm:$0xff] }
  0x1c   :  { %299 = vmatpush.msra.mxu1 %v41_v50  ;;  %280 = vmatpush.msra.mxu0 %v24_v52  ;;  %v146_v17 = vld [vmem:[%s1216_s1 + $0x3e0] sm:$0xff]  ;;  %v96_v18 = vld [vmem:[%s1216_s1 + $0x250] sm:$0xff]  ;;  %v113_v19 = vld [vmem:[%s1216_s1 + $0x2d8] sm:$0xff] }
  0x1d   :  { %339 = vmatpush.msra.mxu3 %v73_v51  ;;  %320 = vmatpush.msra.mxu2 %v56_v53  ;;  %v128_v20 = vld [vmem:[%s1216_s1 + $0x350] sm:$0xff]  ;;  %v145_v21 = vld [vmem:[%s1216_s1 + $0x3d8] sm:$0xff]  ;;  %v95_v22 = vld [vmem:[%s1216_s1 + $0x248] sm:$0xff] }
  0x1e   :  { %300 = vmatpush.msra.mxu1 %v40_v54  ;;  %281 = vmatpush.msra.mxu0 %v23_v56  ;;  %v112_v23 = vld [vmem:[%s1216_s1 + $0x2d0] sm:$0xff]  ;;  %v127_v24 = vld [vmem:[%s1216_s1 + $0x348] sm:$0xff]  ;;  %v15_v26 = vld [vmem:[%s1215_s0] sm:$0xff] }
  0x1f   :  { %340 = vmatpush.msra.mxu3 %v72_v55  ;;  %321 = vmatpush.msra.mxu2 %v55_v57  ;;  %v144_v25 = vld [vmem:[%s1216_s1 + $0x3d0] sm:$0xff]  ;;  %v16_v27 = vld [vmem:[%s1215_s0 + $0x8] sm:$0xff]  ;;  %v94_v28 = vld [vmem:[%s1216_s1 + $0x240] sm:$0xff]  ;;  %229 = vst [vmem:[#allocation1] ss:$2 sm:$0xff] %v15_v26 }
  0x20   :  { %301 = vmatpush.msra.mxu1 %v39_v58  ;;  %282 = vmatpush.msra.mxu0 %v22_v60  ;;  %v111_v29 = vld [vmem:[%s1216_s1 + $0x2c8] sm:$0xff]  ;;  %v126_v30 = vld [vmem:[%s1216_s1 + $0x340] sm:$0xff]  ;;  %v93_v32 = vld [vmem:[%s1216_s1 + $0x238] sm:$0xff]  ;;  %231 = vst [vmem:[#allocation1 + $0x10] ss:$2 sm:$0xff] %v16_v27 }
  0x21   :  { %341 = vmatpush.msra.mxu3 %v71_v59  ;;  %322 = vmatpush.msra.mxu2 %v54_v61  ;;  %v143_v31 = vld [vmem:[%s1216_s1 + $0x3c8] sm:$0xff]  ;;  %v110_v33 = vld [vmem:[%s1216_s1 + $0x2c0] sm:$0xff]  ;;  %v125_v34 = vld [vmem:[%s1216_s1 + $0x338] sm:$0xff] }
  0x22   :  { %347 = vmatpush.msrb.mxu0 %v101_v62  ;;  %302 = vmatpush.msra.mxu1 %v38_v0  ;;  %v142_v35 = vld [vmem:[%s1216_s1 + $0x3c0] sm:$0xff]  ;;  %v92_v36 = vld [vmem:[%s1216_s1 + $0x230] sm:$0xff]  ;;  %v109_v37 = vld [vmem:[%s1216_s1 + $0x2b8] sm:$0xff] }
  0x23   :  { %387 = vmatpush.msrb.mxu2 %v133_v63  ;;  %342 = vmatpush.msra.mxu3 %v70_v1  ;;  %v124_v38 = vld [vmem:[%s1216_s1 + $0x330] sm:$0xff]  ;;  %v141_v39 = vld [vmem:[%s1216_s1 + $0x3b8] sm:$0xff]  ;;  %v91_v40 = vld [vmem:[%s1216_s1 + $0x228] sm:$0xff] }
  0x24   :  { %348 = vmatpush.msrb.mxu0 %v100_v2  ;;  %367 = vmatpush.msrb.mxu1 %v117_v3  ;;  %v108_v41 = vld [vmem:[%s1216_s1 + $0x2b0] sm:$0xff]  ;;  %v123_v42 = vld [vmem:[%s1216_s1 + $0x328] sm:$0xff]  ;;  %v19_v44 = vld [vmem:[%s1215_s0 + $0x20] sm:$0xff] }
  0x25   :  { %388 = vmatpush.msrb.mxu2 %v132_v4  ;;  %407 = vmatpush.msrb.mxu3 %v149_v5  ;;  %v140_v43 = vld [vmem:[%s1216_s1 + $0x3b0] sm:$0xff]  ;;  %v18_v45 = vld [vmem:[%s1215_s0 + $0x18] sm:$0xff]  ;;  %v90_v46 = vld [vmem:[%s1216_s1 + $0x220] sm:$0xff] }
  0x26   :  { %349 = vmatpush.msrb.mxu0 %v99_v6  ;;  %368 = vmatpush.msrb.mxu1 %v116_v7  ;;  %v107_v47 = vld [vmem:[%s1216_s1 + $0x2a8] sm:$0xff]  ;;  %235 = vst [vmem:[#allocation1 + $0x30] ss:$2 sm:$0xff] %v18_v45  ;;  %v236_v49 = vld.sshfl [vmem:[#allocation1] sm:$0xff pattern:$0x75316420] }
  0x27   :  { %389 = vmatpush.msrb.mxu2 %v131_v8  ;;  %408 = vmatpush.msrb.mxu3 %v148_v9  ;;  %v20_v48 = vld [vmem:[%s1215_s0 + $0x28] sm:$0xff]  ;;  %v122_v51 = vld [vmem:[%s1216_s1 + $0x320] sm:$0xff]  ;;  %v238_v52 = vld.sshfl [vmem:[#allocation1 + $0x10] sm:$0xff pattern:$0x75316420] }
  0x28   :  { %350 = vmatpush.msrb.mxu0 %v98_v10  ;;  %369 = vmatpush.msrb.mxu1 %v115_v11  ;;  %v933_v50 = vld.sshfl [vmem:[#allocation1 + $0x8] sm:$0xff pattern:$0x75316420]  ;;  %v239_v54 = vld.sshfl [vmem:[#allocation1 + $0x18] sm:$0xff pattern:$0x75316420] }
  0x29   :  { %390 = vmatpush.msrb.mxu2 %v130_v12  ;;  %409 = vmatpush.msrb.mxu3 %v147_v13  ;;  %244 = vst [vmem:[#allocation1] ss:$2 sm:$0xff] %v19_v44  ;;  %v139_v53 = vld [vmem:[%s1216_s1 + $0x3a8] sm:$0xff]  ;;  %v17_v55 = vld [vmem:[%s1215_s0 + $0x10] sm:$0xff]  ;;  %v89_v56 = vld [vmem:[%s1216_s1 + $0x218] sm:$0xff] }
  0x2a   :  { %351 = vmatpush.msrb.mxu0 %v97_v14  ;;  %370 = vmatpush.msrb.mxu1 %v114_v15  ;;  %v106_v57 = vld [vmem:[%s1216_s1 + $0x2a0] sm:$0xff]  ;;  %245 = vst [vmem:[#allocation1 + $0x10] ss:$2 sm:$0xff] %v20_v48  ;;  %v121_v58 = vld [vmem:[%s1216_s1 + $0x318] sm:$0xff]  ;;  %v88_v60 = vld [vmem:[%s1216_s1 + $0x210] sm:$0xff] }
  0x2b   :  { %391 = vmatpush.msrb.mxu2 %v129_v16  ;;  %410 = vmatpush.msrb.mxu3 %v146_v17  ;;  %v138_v59 = vld [vmem:[%s1216_s1 + $0x3a0] sm:$0xff]  ;;  %233 = vst [vmem:[#allocation1 + $0x20] ss:$2 sm:$0xff] %v17_v55  ;;  %v105_v61 = vld [vmem:[%s1216_s1 + $0x298] sm:$0xff]  ;;  %v120_v62 = vld [vmem:[%s1216_s1 + $0x310] sm:$0xff] }
  0x2c   :  { %352 = vmatpush.msrb.mxu0 %v96_v18  ;;  %371 = vmatpush.msrb.mxu1 %v113_v19  ;;  %v137_v63 = vld [vmem:[%s1216_s1 + $0x398] sm:$0xff]  ;;  %v87_v0 = vld [vmem:[%s1216_s1 + $0x208] sm:$0xff]  ;;  %v104_v1 = vld [vmem:[%s1216_s1 + $0x290] sm:$0xff] }
  0x2d   :  { %392 = vmatpush.msrb.mxu2 %v128_v20  ;;  %411 = vmatpush.msrb.mxu3 %v145_v21  ;;  %v119_v2 = vld [vmem:[%s1216_s1 + $0x308] sm:$0xff]  ;;  %v136_v3 = vld [vmem:[%s1216_s1 + $0x390] sm:$0xff]  ;;  %v86_v4 = vld [vmem:[%s1216_s1 + $0x200] sm:$0xff] }
  0x2e   :  { %353 = vmatpush.msrb.mxu0 %v95_v22  ;;  %372 = vmatpush.msrb.mxu1 %v112_v23  ;;  %v103_v5 = vld [vmem:[%s1216_s1 + $0x288] sm:$0xff]  ;;  %v21_v6 = vld [vmem:[%s1215_s0 + $0x30] sm:$0xf]  ;;  %v118_v7 = vld [vmem:[%s1216_s1 + $0x300] sm:$0xff] }
  0x2f   :  { %393 = vmatpush.msrb.mxu2 %v127_v24  ;;  %412 = vmatpush.msrb.mxu3 %v144_v25  ;;  %v135_v8 = vld [vmem:[%s1216_s1 + $0x388] sm:$0xff]  ;;  %v165_v11 = vld [vmem:[%s1216_s1 + $0x478] sm:$0xff]  ;;  %v102_v13 = vld [vmem:[%s1216_s1 + $0x280] sm:$0xff] }
  0x30   :  { %354 = vmatpush.msrb.mxu0 %v94_v28  ;;  %373 = vmatpush.msrb.mxu1 %v111_v29  ;;  %v197_v12 = vld [vmem:[%s1216_s1 + $0x578] sm:$0xff]  ;;  %v134_v14 = vld [vmem:[%s1216_s1 + $0x380] sm:$0xff]  ;;  %v164_v15 = vld [vmem:[%s1216_s1 + $0x470] sm:$0xff] }
  0x31   :  { %394 = vmatpush.msrb.mxu2 %v126_v30  ;;  %413 = vmatpush.msrb.mxu3 %v143_v31  ;;  %v181_v16 = vld [vmem:[%s1216_s1 + $0x4f8] sm:$0xff]  ;;  %v196_v17 = vld [vmem:[%s1216_s1 + $0x570] sm:$0xff]  ;;  %v163_v19 = vld [vmem:[%s1216_s1 + $0x468] sm:$0xff] }
  0x32   :  { %355 = vmatpush.msrb.mxu0 %v93_v32  ;;  %374 = vmatpush.msrb.mxu1 %v110_v33  ;;  %v240_v9 = vld.sshfl [vmem:[#allocation1 + $0x20] sm:$0xff pattern:$0x75316420]  ;;  %v995_v10 = vld.sshfl [vmem:[#allocation1 + $0x28] sm:$0xff pattern:$0x75316420] }
  0x33   :  { %395 = vmatpush.msrb.mxu2 %v125_v34  ;;  %414 = vmatpush.msrb.mxu3 %v142_v35  ;;  %246 = vst [vmem:[#allocation1 + $0x20] ss:$2 sm:$0xff] %v21_v6  ;;  %v213_v18 = vld [vmem:[%s1216_s1 + $0x5f8] sm:$0xff]  ;;  %v180_v20 = vld [vmem:[%s1216_s1 + $0x4f0] sm:$0xff]  ;;  %v195_v21 = vld [vmem:[%s1216_s1 + $0x568] sm:$0xff] }
  0x34   :  { %356 = vmatpush.msrb.mxu0 %v92_v36  ;;  %375 = vmatpush.msrb.mxu1 %v109_v37  ;;  %v212_v22 = vld [vmem:[%s1216_s1 + $0x5f0] sm:$0xff]  ;;  %v162_v23 = vld [vmem:[%s1216_s1 + $0x460] sm:$0xff]  ;;  %v179_v24 = vld [vmem:[%s1216_s1 + $0x4e8] sm:$0xff] }
  0x35   :  { %396 = vmatpush.msrb.mxu2 %v124_v38  ;;  %415 = vmatpush.msrb.mxu3 %v141_v39  ;;  %v194_v25 = vld [vmem:[%s1216_s1 + $0x560] sm:$0xff]  ;;  %v211_v26 = vld [vmem:[%s1216_s1 + $0x5e8] sm:$0xff]  ;;  %v242_v27 = vld.sshfl [vmem:[#allocation1 + $0x30] sm:$0xff pattern:$0x75316420] }
  0x36   :  { %357 = vmatpush.msrb.mxu0 %v91_v40  ;;  %376 = vmatpush.msrb.mxu1 %v108_v41  ;;  %v161_v28 = vld [vmem:[%s1216_s1 + $0x458] sm:$0xff]  ;;  %v178_v29 = vld [vmem:[%s1216_s1 + $0x4e0] sm:$0xff] }
  0x37   :  { %397 = vmatpush.msrb.mxu2 %v123_v42  ;;  %416 = vmatpush.msrb.mxu3 %v140_v43  ;;  %v193_v30 = vld [vmem:[%s1216_s1 + $0x558] sm:$0xff]  ;;  %v210_v31 = vld [vmem:[%s1216_s1 + $0x5e0] sm:$0xff] }
  0x38   :  { %358 = vmatpush.msrb.mxu0 %v90_v46  ;;  %377 = vmatpush.msrb.mxu1 %v107_v47 }
  0x39   :  { %398 = vmatpush.msrb.mxu2 %v122_v51  ;;  %417 = vmatpush.msrb.mxu3 %v139_v53 }
  0x3a   :  { %359 = vmatpush.msrb.mxu0 %v89_v56  ;;  %378 = vmatpush.msrb.mxu1 %v106_v57 }
  0x3b   :  { %399 = vmatpush.msrb.mxu2 %v121_v58  ;;  %418 = vmatpush.msrb.mxu3 %v138_v59 }
  0x3c   :  { %360 = vmatpush.msrb.mxu0 %v88_v60  ;;  %379 = vmatpush.msrb.mxu1 %v105_v61 }
  0x3d   :  { %400 = vmatpush.msrb.mxu2 %v120_v62  ;;  %419 = vmatpush.msrb.mxu3 %v137_v63 }
  0x3e   :  { %361 = vmatpush.msrb.mxu0 %v87_v0  ;;  %380 = vmatpush.msrb.mxu1 %v104_v1 }
  0x3f   :  { %401 = vmatpush.msrb.mxu2 %v119_v2  ;;  %420 = vmatpush.msrb.mxu3 %v136_v3 }
  0x40   :  { %362 = vmatpush.msrb.mxu0 %v86_v4  ;;  %381 = vmatpush.msrb.mxu1 %v103_v5 }
  0x41   :  { %402 = vmatpush.msrb.mxu2 %v118_v7  ;;  %421 = vmatpush.msrb.mxu3 %v135_v8 }
  0x42   :  { %283 = vmatmul.f32.vlgmr.msra.gmra.mxu0 %v236_v49  ;;  %323 = vmatmul.f32.vlgmr.msra.gmra.mxu2 %v238_v52 }
  0x43   :  { %427 = vmatpush.msra.mxu0 %v165_v11  ;;  %467 = vmatpush.msra.mxu2 %v197_v12 }
  0x44   :  { %382 = vmatpush.msrb.mxu1 %v102_v13  ;;  %422 = vmatpush.msrb.mxu3 %v134_v14 }
  0x45   :  { %303 = vmatmul.f32.vlgmr.msra.gmra.mxu1 %v933_v50  ;;  %343 = vmatmul.f32.vlgmr.msra.gmra.mxu3 %v239_v54 }
  0x46   :  { %428 = vmatpush.msra.mxu0 %v164_v15  ;;  %447 = vmatpush.msra.mxu1 %v181_v16 }
  0x47   :  { %468 = vmatpush.msra.mxu2 %v196_v17  ;;  %487 = vmatpush.msra.mxu3 %v213_v18 }
  0x48   :  { %429 = vmatpush.msra.mxu0 %v163_v19  ;;  %448 = vmatpush.msra.mxu1 %v180_v20 }
  0x49   :  { %469 = vmatpush.msra.mxu2 %v195_v21  ;;  %488 = vmatpush.msra.mxu3 %v212_v22 }
  0x4a   :  { %430 = vmatpush.msra.mxu0 %v162_v23  ;;  %449 = vmatpush.msra.mxu1 %v179_v24 }
  0x4b   :  { %470 = vmatpush.msra.mxu2 %v194_v25  ;;  %489 = vmatpush.msra.mxu3 %v211_v26 }
  0x4c   :  { %8 = vsyncpa [#allocation3], 0  ;;  %403 = vmatmul.f32.vlgmr.msrb.gmra.mxu2 %v242_v27  ;;  %431 = vmatpush.msra.mxu0 %v161_v28  ;;  %v243_v32 = vld.sshfl [vmem:[#allocation1 + $0x38] sm:$0xff pattern:$0x75316420]  ;;  %v160_v33 = vld [vmem:[%s1216_s1 + $0x450] sm:$0xff] }
  0x4d   :  { %450 = vmatpush.msra.mxu1 %v178_v29  ;;  %471 = vmatpush.msra.mxu2 %v193_v30  ;;  %v177_v34 = vld [vmem:[%s1216_s1 + $0x4d8] sm:$0xff]  ;;  %v192_v35 = vld [vmem:[%s1216_s1 + $0x550] sm:$0xff]  ;;  %v159_v37 = vld [vmem:[%s1216_s1 + $0x448] sm:$0xff]  ;;  %vm264_vm0 = vcmask 261120   ;;  %s535_s11 = sshll.u32 %s1218_s3, 4  ;;  %s536_s11 = int_to_ptr.hbm [resolvable:$true] %s535_s11 }
  0x4e   :  { %490 = vmatpush.msra.mxu3 %v210_v31  ;;  %363 = vmatmul.f32.vlgmr.msrb.gmra.mxu0 %v240_v9  ;;  %v209_v36 = vld [vmem:[%s1216_s1 + $0x5d8] sm:$0xff]  ;;  %v176_v38 = vld [vmem:[%s1216_s1 + $0x4d0] sm:$0xff]  ;;  %v191_v39 = vld [vmem:[%s1216_s1 + $0x548] sm:$0xff] }
  0x4f   :  { %423 = vmatmul.f32.vlgmr.msrb.gmra.mxu3 %v243_v32  ;;  %432 = vmatpush.msra.mxu0 %v160_v33  ;;  %v208_v40 = vld [vmem:[%s1216_s1 + $0x5d0] sm:$0xff]  ;;  %v158_v41 = vld [vmem:[%s1216_s1 + $0x440] sm:$0xff]  ;;  %v175_v42 = vld [vmem:[%s1216_s1 + $0x4c8] sm:$0xff] }
  0x50   :  { %451 = vmatpush.msra.mxu1 %v177_v34  ;;  %472 = vmatpush.msra.mxu2 %v192_v35  ;;  %v190_v43 = vld [vmem:[%s1216_s1 + $0x540] sm:$0xff]  ;;  %v207_v44 = vld [vmem:[%s1216_s1 + $0x5c8] sm:$0xff]  ;;  %v157_v45 = vld [vmem:[%s1216_s1 + $0x438] sm:$0xff] }
  0x51   :  { %491 = vmatpush.msra.mxu3 %v209_v36  ;;  %383 = vmatmul.f32.vlgmr.msrb.gmra.mxu1 %v995_v10  ;;  %v174_v46 = vld [vmem:[%s1216_s1 + $0x4c0] sm:$0xff]  ;;  %v189_v47 = vld [vmem:[%s1216_s1 + $0x538] sm:$0xff]  ;;  %v156_v49 = vld [vmem:[%s1216_s1 + $0x430] sm:$0xff] }
  0x52   :  { %433 = vmatpush.msra.mxu0 %v159_v37  ;;  %452 = vmatpush.msra.mxu1 %v176_v38  ;;  %v206_v48 = vld [vmem:[%s1216_s1 + $0x5c0] sm:$0xff]  ;;  %v173_v50 = vld [vmem:[%s1216_s1 + $0x4b8] sm:$0xff]  ;;  %v188_v51 = vld [vmem:[%s1216_s1 + $0x530] sm:$0xff] }
  0x53   :  { %473 = vmatpush.msra.mxu2 %v191_v39  ;;  %492 = vmatpush.msra.mxu3 %v208_v40  ;;  %v205_v52 = vld [vmem:[%s1216_s1 + $0x5b8] sm:$0xff]  ;;  %v155_v53 = vld [vmem:[%s1216_s1 + $0x428] sm:$0xff]  ;;  %v172_v54 = vld [vmem:[%s1216_s1 + $0x4b0] sm:$0xff] }
  0x54   :  { %434 = vmatpush.msra.mxu0 %v158_v41  ;;  %453 = vmatpush.msra.mxu1 %v175_v42  ;;  %v187_v55 = vld [vmem:[%s1216_s1 + $0x528] sm:$0xff]  ;;  %v204_v56 = vld [vmem:[%s1216_s1 + $0x5b0] sm:$0xff]  ;;  %v154_v57 = vld [vmem:[%s1216_s1 + $0x420] sm:$0xff] }
  0x55   :  { %474 = vmatpush.msra.mxu2 %v190_v43  ;;  %493 = vmatpush.msra.mxu3 %v207_v44  ;;  %v171_v58 = vld [vmem:[%s1216_s1 + $0x4a8] sm:$0xff]  ;;  %v186_v59 = vld [vmem:[%s1216_s1 + $0x520] sm:$0xff]  ;;  %v153_v61 = vld [vmem:[%s1216_s1 + $0x418] sm:$0xff] }
  0x56   :  { %435 = vmatpush.msra.mxu0 %v157_v45  ;;  %454 = vmatpush.msra.mxu1 %v174_v46  ;;  %v203_v60 = vld [vmem:[%s1216_s1 + $0x5a8] sm:$0xff]  ;;  %v170_v62 = vld [vmem:[%s1216_s1 + $0x4a0] sm:$0xff]  ;;  %v185_v63 = vld [vmem:[%s1216_s1 + $0x518] sm:$0xff] }
  0x57   :  { %475 = vmatpush.msra.mxu2 %v189_v47  ;;  %494 = vmatpush.msra.mxu3 %v206_v48  ;;  %v202_v0 = vld [vmem:[%s1216_s1 + $0x5a0] sm:$0xff]  ;;  %v152_v1 = vld [vmem:[%s1216_s1 + $0x410] sm:$0xff]  ;;  %v169_v2 = vld [vmem:[%s1216_s1 + $0x498] sm:$0xff] }
  0x58   :  { %436 = vmatpush.msra.mxu0 %v156_v49  ;;  %455 = vmatpush.msra.mxu1 %v173_v50  ;;  %v184_v3 = vld [vmem:[%s1216_s1 + $0x510] sm:$0xff]  ;;  %v201_v4 = vld [vmem:[%s1216_s1 + $0x598] sm:$0xff]  ;;  %v151_v5 = vld [vmem:[%s1216_s1 + $0x408] sm:$0xff] }
  0x59   :  { %476 = vmatpush.msra.mxu2 %v188_v51  ;;  %495 = vmatpush.msra.mxu3 %v205_v52  ;;  %v168_v6 = vld [vmem:[%s1216_s1 + $0x490] sm:$0xff]  ;;  %v183_v7 = vld [vmem:[%s1216_s1 + $0x508] sm:$0xff]  ;;  %v150_v9 = vld [vmem:[%s1216_s1 + $0x400] sm:$0xff] }
  0x5a   :  { %437 = vmatpush.msra.mxu0 %v155_v53  ;;  %456 = vmatpush.msra.mxu1 %v172_v54  ;;  %v200_v8 = vld [vmem:[%s1216_s1 + $0x590] sm:$0xff]  ;;  %v167_v10 = vld [vmem:[%s1216_s1 + $0x488] sm:$0xff]  ;;  %v182_v11 = vld [vmem:[%s1216_s1 + $0x500] sm:$0xff] }
  0x5b   :  { %477 = vmatpush.msra.mxu2 %v187_v55  ;;  %496 = vmatpush.msra.mxu3 %v204_v56  ;;  %v199_v12 = vld [vmem:[%s1216_s1 + $0x588] sm:$0xff]  ;;  %v247_v13 = vld.sshfl [vmem:[#allocation1] sm:$0xff pattern:$0x75316420]  ;;  %v217_v19 = vld [vmem:[%s1216_s1 + $0x618] sm:$0xff] }
  0x5c   :  { %438 = vmatpush.msra.mxu0 %v154_v57  ;;  %457 = vmatpush.msra.mxu1 %v171_v58  ;;  %v249_v14 = vld.sshfl [vmem:[#allocation1 + $0x10] sm:$0xff pattern:$0x75316420]  ;;  %v166_v15 = vld [vmem:[%s1216_s1 + $0x480] sm:$0xff]  ;;  %v215_v21 = vld [vmem:[%s1216_s1 + $0x608] sm:$0xff] }
  0x5d   :  { %478 = vmatpush.msra.mxu2 %v186_v59  ;;  %497 = vmatpush.msra.mxu3 %v203_v60  ;;  %v198_v16 = vld [vmem:[%s1216_s1 + $0x580] sm:$0xff]  ;;  %v248_v17 = vld.sshfl [vmem:[#allocation1 + $0x8] sm:$0xff pattern:$0x75316420]  ;;  %v216_v20 = vld [vmem:[%s1216_s1 + $0x610] sm:$0xff] }
  0x5e   :  { %439 = vmatpush.msra.mxu0 %v153_v61  ;;  %458 = vmatpush.msra.mxu1 %v170_v62  ;;  %v250_v18 = vld.sshfl [vmem:[#allocation1 + $0x18] sm:$0xff pattern:$0x75316420]  ;;  %v214_v22 = vld [vmem:[%s1216_s1 + $0x600] sm:$0xff]  ;;  %s573_s1 = smov [#allocation2]  }
  0x5f   :  { %479 = vmatpush.msra.mxu2 %v185_v63  ;;  %498 = vmatpush.msra.mxu3 %v202_v0  ;;  %v251_v23 = vld.sshfl [vmem:[#allocation1 + $0x20] sm:$0xff pattern:$0x75316420] }
  0x60   :  { %440 = vmatpush.msra.mxu0 %v152_v1  ;;  %459 = vmatpush.msra.mxu1 %v169_v2  ;;  %v546_v24 = vld [vmem:[%s1217_s2] ss:$0 sm:$0xff]  ;;  %s533_s2 = sshll.u32 %s573_s1, 4  ;;  %s534_s2 = int_to_ptr.vmem [resolvable:$true] %s533_s2 }
  0x61   :  { %480 = vmatpush.msra.mxu2 %v184_v3  ;;  %499 = vmatpush.msra.mxu3 %v201_v4 }
  0x62   :  { %441 = vmatpush.msra.mxu0 %v151_v5  ;;  %460 = vmatpush.msra.mxu1 %v168_v6 }
  0x63   :  { %481 = vmatpush.msra.mxu2 %v183_v7  ;;  %500 = vmatpush.msra.mxu3 %v200_v8 }
  0x64   :  { %442 = vmatpush.msra.mxu0 %v150_v9  ;;  %461 = vmatpush.msra.mxu1 %v167_v10 }
  0x65   :  { %482 = vmatpush.msra.mxu2 %v182_v11  ;;  %501 = vmatpush.msra.mxu3 %v199_v12 }
  0x66   :  { %443 = vmatmul.f32.vlgmr.msra.gmra.mxu0 %v247_v13  ;;  %483 = vmatmul.f32.vlgmr.msra.gmra.mxu2 %v249_v14 }
  0x67   :  { %462 = vmatpush.msra.mxu1 %v166_v15  ;;  %502 = vmatpush.msra.mxu3 %v198_v16 }
  0x68   :  { %463 = vmatmul.f32.vlgmr.msra.gmra.mxu1 %v248_v17  ;;  %503 = vmatmul.f32.vlgmr.msra.gmra.mxu3 %v250_v18 }
  0x69   :  { %519 = vmatpush.msrb.mxu0 %v217_v19 }
  0x6b   :  { %520 = vmatpush.msrb.mxu0 %v216_v20 }
  0x6d   :  { %521 = vmatpush.msrb.mxu0 %v215_v21 }
  0x6f   :  { %522 = vmatpush.msrb.mxu0 %v214_v22 }
  0x70   :  { %544 = vmatmul.msk.f32.vlgmr.msrb.gmra.mxu0 %vm264_vm0, %v251_v23 }
  0xbf   :  { %v284_v25 = vpop.f32.mrf.mxu0 }
  0xc0   :  { %v285_v26 = vadd.f32 %v546_v24, %v284_v25 }
  0xc2   :  { %v304_v27 = vpop.f32.mrf.mxu1 }
  0xc3   :  { %v305_v28 = vadd.f32 %v304_v27, %v285_v26 }
  0xc5   :  { %v324_v29 = vpop.f32.mrf.mxu2 }
  0xc6   :  { %v325_v30 = vadd.f32 %v324_v29, %v305_v28 }
  0xc8   :  { %v344_v31 = vpop.f32.mrf.mxu3 }
  0xc9   :  { %v345_v32 = vadd.f32 %v344_v31, %v325_v30 }
  0xcb   :  { %v364_v33 = vpop.f32.mrf.mxu0 }
  0xcc   :  { %v365_v34 = vadd.f32 %v364_v33, %v345_v32 }
  0xce   :  { %v384_v35 = vpop.f32.mrf.mxu1 }
  0xcf   :  { %v385_v36 = vadd.f32 %v384_v35, %v365_v34  ;;  %v404_v37 = vpop.f32.mrf.mxu2 }
  0xd1   :  { %v405_v38 = vadd.f32 %v404_v37, %v385_v36 }
  0xd2   :  { %v424_v39 = vpop.f32.mrf.mxu3 }
  0xd3   :  { %v425_v40 = vadd.f32 %v424_v39, %v405_v38 }
  0xe3   :  { %v444_v41 = vpop.f32.mrf.mxu0 }
  0xe4   :  { %v445_v42 = vadd.f32 %v444_v41, %v425_v40 }
  0xe5   :  { %v464_v43 = vpop.f32.mrf.mxu1 }
  0xe6   :  { %v465_v44 = vadd.f32 %v464_v43, %v445_v42 }
  0xe9   :  { %v484_v45 = vpop.f32.mrf.mxu2 }
  0xea   :  { %v485_v46 = vadd.f32 %v484_v45, %v465_v44 }
  0xeb   :  { %v504_v47 = vpop.f32.mrf.mxu3 }
  0xec   :  { %v505_v48 = vadd.f32 %v504_v47, %v485_v46 }
  0xed   :  { %v524_v49 = vpop.f32.mrf.mxu0 }
  0xee   :  { %v525_v50 = vadd.f32 %v524_v49, %v505_v48 }
  0xf0   :  { %527 = vst [vmem:[#allocation2] sm:$0xf] %v525_v50 }
  0xf1   :  { %538 = dma.vmem_to_hbm [thread:$0]  %s534_s2, 64, %s536_s11, [#allocation3]  }
  0xf2   :  { %571 = dma.done.wait [#allocation3], 64  }
  0xf3   :  { %572 = vsyncadd [#allocation3], 4294967232 }
  0xf4   :  { %543 = vsyncpa [#allocation3], 1 }

</bundles_post_ra>
